<compile_context>
chip_gen: v6e
topology: v6e:2x2x1
jax: 0.10.0
libtpu: 0.0.40
codegen_flags: <defaults>
</compile_context>

<pallas_src>
import functools

import jax
import jax.numpy as jnp
from jax.experimental import pallas as pl
from jax.experimental.pallas import tpu as pltpu

# (num_embeddings, embedding_dim) for the 7 discrete features, as in the PyTorch module.
EMB_SPECS = [(17, 4), (2, 1), (7, 4), (14, 4), (6, 4), (5, 4), (41, 4)]
H1, H2 = 64, 32      # expert hidden layers
T1, T2 = 64, 32      # tower hidden layers


def _round_up(x, m):
    return (x + m - 1) // m * m


# --------------------------------------------------------------------------------------
# Pallas kernel
# --------------------------------------------------------------------------------------
def _mmoe_kernel(x_ref, we1_ref, be1_ref, gw_ref, gb_ref, w2_ref, b2_ref,
                 w3_ref, b3_ref, sel_ref, tw1_ref, tb1_ref, tw2_ref, tb2_ref,
                 tw3_ref, tb3_ref, out_ref, *, n_expert, n_task):
    f32 = jnp.float32
    bf16 = jnp.bfloat16

    x = x_ref[...]                                                        # (TB, F) bf16

    # ---- expert layer 1 (all experts fused along N) + a separate narrow gate-logit dot ----
    h1 = jnp.maximum(jnp.dot(x, we1_ref[...], preferred_element_type=f32)
                     + be1_ref[...], 0.0).astype(bf16)                    # (TB, NE*H1)
    logits = (jnp.dot(x, gw_ref[...], preferred_element_type=f32)
              + gb_ref[...])                                              # (TB, NT*NE) f32

    # ---- expert layers 2/3 as block-diagonal fused matmuls (layer-3 cols padded to 128) ----
    h2 = jnp.maximum(jnp.dot(h1, w2_ref[...], preferred_element_type=f32)
                     + b2_ref[...], 0.0).astype(bf16)                     # (TB, NE*H2)
    e3 = jnp.maximum(jnp.dot(h2, w3_ref[...], preferred_element_type=f32)
                     + b3_ref[...], 0.0)                                  # (TB, PAD_SEG) f32

    # ---- per-task softmax; gate expanded over expert-output lanes via bf16 selection dot ----
    sel = sel_ref[...]                                                    # (NE, PAD_SEG) bf16
    weighted = []
    for t in range(n_task):
        lt = logits[:, t * n_expert:(t + 1) * n_expert]                   # (TB, NE)
        m = jnp.max(lt, axis=-1, keepdims=True)
        p = jnp.exp(lt - m)
        g = p * pl.reciprocal(jnp.sum(p, axis=-1, keepdims=True), approx=True)
        g_exp = jnp.dot(g.astype(bf16), sel, preferred_element_type=f32)  # (TB, PAD_SEG)
        weighted.append(g_exp * e3)                                       # gate_t[:,e]*Expert_e
    # Segments are vreg-aligned (128 lanes each) -> concat is layout-clean.
    wmix = jnp.concatenate(weighted, axis=-1).astype(bf16)                # (TB, NT*PAD_SEG)

    # ---- towers, fused block-diagonally across tasks; expert-sum folded into tw1 ----
    th = jnp.maximum(jnp.dot(wmix, tw1_ref[...], preferred_element_type=f32)
                     + tb1_ref[...], 0.0).astype(bf16)                    # (TB, NT*T1)
    th = jnp.maximum(jnp.dot(th, tw2_ref[...], preferred_element_type=f32)
                     + tb2_ref[...], 0.0).astype(bf16)                    # (TB, NT*T2)
    y = jnp.dot(th, tw3_ref[...], preferred_element_type=f32) + tb3_ref[...]   # (TB, NT)
    out_ref[...] = y.astype(out_ref.dtype)


# --------------------------------------------------------------------------------------
# Weight packing (wrapper-side, plain JAX)
# --------------------------------------------------------------------------------------
def _block_diag(mats):
    rows = sum(m.shape[0] for m in mats)
    cols = sum(m.shape[1] for m in mats)
    out = jnp.zeros((rows, cols), mats[0].dtype)
    r = c = 0
    for m in mats:
        out = out.at[r:r + m.shape[0], c:c + m.shape[1]].set(m)
        r += m.shape[0]
        c += m.shape[1]
    return out


def _pack_params(p, *, n_expert, n_task, expert_dim):
    NE, NT, E = n_expert, n_task, expert_dim
    f32, bf16 = jnp.float32, jnp.bfloat16
    pad_seg = _round_up(NE * E, 128)        # per-task mixture segment width (lane-aligned)
    col_pad = pad_seg - NE * E

    # Expert layer 1 (column-concat) and gate weights (separate narrow matrix).
    we1 = jnp.concatenate([p["w1"][e] for e in range(NE)], axis=1)              # (F, NE*H1)
    be1 = jnp.concatenate([p["b1"][e] for e in range(NE)])[None, :]
    gw = jnp.concatenate([p["gw"][t] for t in range(NT)], axis=1)               # (F, NT*NE)
    gb = jnp.concatenate([p["gb"][t] for t in range(NT)])[None, :]
    # Expert layers 2/3, block-diagonal across experts; layer-3 output padded to pad_seg.
    w2bd = _block_diag([p["w2"][e] for e in range(NE)])                         # (NE*H1, NE*H2)
    b2 = jnp.concatenate([p["b2"][e] for e in range(NE)])[None, :]
    w3bd = jnp.pad(_block_diag([p["w3"][e] for e in range(NE)]),
                   ((0, 0), (0, col_pad)))                                      # (NE*H2, pad_seg)
    b3 = jnp.pad(jnp.concatenate([p["b3"][e] for e in range(NE)]),
                 (0, col_pad))[None, :]
    # sel[e, e*E + j] = 1 -> expands a (B, NE) gate to (B, pad_seg) lanes (padded lanes 0).
    sel = jnp.pad(jnp.repeat(jnp.eye(NE, dtype=f32), E, axis=1), ((0, 0), (0, col_pad)))
    # Tower layer 1: tiling tw1_t over the expert axis folds the sum-over-experts of the
    # gate-weighted expert outputs directly into the matmul; padded rows are zero.
    tw1_blocks = [jnp.pad(jnp.tile(p["tw1"][t], (NE, 1)), ((0, col_pad), (0, 0)))
                  for t in range(NT)]                                           # (pad_seg, T1)
    tw1bd = _block_diag(tw1_blocks)                                             # (NT*pad_seg, NT*T1)
    tb1 = jnp.concatenate([p["tb1"][t] for t in range(NT)])[None, :]
    tw2bd = _block_diag([p["tw2"][t] for t in range(NT)])                       # (NT*T1, NT*T2)
    tb2 = jnp.concatenate([p["tb2"][t] for t in range(NT)])[None, :]
    tw3bd = _block_diag([p["tw3"][t] for t in range(NT)])                       # (NT*T2, NT)
    tb3 = jnp.concatenate([p["tb3"][t] for t in range(NT)])[None, :]

    return [we1.astype(bf16), be1.astype(f32),
            gw.astype(bf16), gb.astype(f32),
            w2bd.astype(bf16), b2.astype(f32),
            w3bd.astype(bf16), b3.astype(f32),
            sel.astype(bf16),
            tw1bd.astype(bf16), tb1.astype(f32),
            tw2bd.astype(bf16), tb2.astype(f32),
            tw3bd.astype(bf16), tb3.astype(f32)]


def embed_features(x_d, x_c, emb_tables, dtype=jnp.float32):
    # nn.Embedding lookups: tiny tables, data-dependent gather -> done in plain JAX.
    parts = [emb_tables[i][x_d[:, i]].astype(dtype) for i in range(len(emb_tables))]
    parts.append(x_c.astype(dtype))
    return jnp.concatenate(parts, axis=-1)


# --------------------------------------------------------------------------------------
# Forward wrapper
# --------------------------------------------------------------------------------------
def mmoe_forward(x_d, x_c, params, *, n_expert, n_task, expert_dim, tile_b=1024):
    # Concat / pad / cast done in bf16 so the (B, F) intermediate is half-width end to end.
    x = embed_features(x_d, x_c, params["emb"], dtype=jnp.bfloat16)   # (B, F) bf16
    B, F = x.shape

    w_args = _pack_params(params, n_expert=n_expert, n_task=n_task, expert_dim=expert_dim)

    tb = min(tile_b, _round_up(B, 16))
    num_tiles = (B + tb - 1) // tb
    if num_tiles > 1 and num_tiles % 2 == 1:
        num_tiles += 1              # even grid -> both v7x TensorCores stay busy
    b_pad = num_tiles * tb
    if b_pad != B:
        x = jnp.pad(x, ((0, b_pad - B), (0, 0)))

    # Advisory cost estimate so XLA schedules the embedding gathers against the kernel.
    pad_seg = _round_up(n_expert * expert_dim, 128)
    flops_per_row = 2 * (F * n_expert * H1 + F * n_task * n_expert
                         + (n_expert * H1) * (n_expert * H2)
                         + (n_expert * H2) * pad_seg
                         + n_task * n_expert * pad_seg
                         + (n_task * pad_seg) * (n_task * T1)
                         + (n_task * T1) * (n_task * T2)
                         + (n_task * T2) * n_task)
    weight_bytes = sum(int(a.size) * a.dtype.itemsize for a in w_args)
    cost = pl.CostEstimate(
        flops=int(flops_per_row) * int(b_pad),
        transcendentals=int(n_task * n_expert) * int(b_pad),
        bytes_accessed=int(b_pad) * (F * 2 + n_task * 4) + weight_bytes)

    def w_spec(arr):
        # Weights / biases: full-array block, constant index -> stays resident in VMEM.
        return pl.BlockSpec(arr.shape, lambda i: (0, 0))

    out = pl.pallas_call(
        functools.partial(_mmoe_kernel, n_expert=n_expert, n_task=n_task),
        out_shape=jax.ShapeDtypeStruct((b_pad, n_task), jnp.float32),
        grid=(num_tiles,),
        in_specs=[pl.BlockSpec((tb, F), lambda i: (i, 0))] + [w_spec(a) for a in w_args],
        out_specs=pl.BlockSpec((tb, n_task), lambda i: (i, 0)),
        compiler_params=pltpu.CompilerParams(
            dimension_semantics=("parallel",),
            vmem_limit_bytes=48 * 1024 * 1024,
        ),
        cost_estimate=cost,
    )(x, *w_args)

    out = out[:B]   # padded rows produce garbage (uniform gates); keep this slice.
    # Match PyTorch MMoE.forward: a list of n_task tensors of shape (B, 1).
    return [out[:, t:t + 1] for t in range(n_task)]


# --------------------------------------------------------------------------------------
# Init + pure-JAX reference
# --------------------------------------------------------------------------------------
def init_params(key, feature_dim, expert_dim, n_expert, n_task):
    keys = jax.random.split(key, 24)
    ki = iter(keys)

    def u(shape, fan_in):
        b = 1.0 / jnp.sqrt(fan_in)     # mimic nn.Linear default init range
        return jax.random.uniform(next(ki), shape, jnp.float32, -b, b)

    emb = [jax.random.normal(next(ki), (n, d), jnp.float32) for n, d in EMB_SPECS]
    return {
        "emb": emb,
        "w1": u((n_expert, feature_dim, H1), feature_dim),
        "b1": u((n_expert, H1), feature_dim),
        "w2": u((n_expert, H1, H2), H1),
        "b2": u((n_expert, H2), H1),
        "w3": u((n_expert, H2, expert_dim), H2),
        "b3": u((n_expert, expert_dim), H2),
        "gw": u((n_task, feature_dim, n_expert), feature_dim),
        "gb": u((n_task, n_expert), feature_dim),
        "tw1": u((n_task, expert_dim, T1), expert_dim),
        "tb1": u((n_task, T1), expert_dim),
        "tw2": u((n_task, T1, T2), T1),
        "tb2": u((n_task, T2), T1),
        "tw3": u((n_task, T2, 1), T2),
        "tb3": u((n_task, 1), T2),
    }


def reference_forward(x_d, x_c, params, *, n_expert, n_task):
    relu = lambda v: jnp.maximum(v, 0.0)
    x = embed_features(x_d, x_c, params["emb"], dtype=jnp.float32)
    experts = []
    for e in range(n_expert):
        h = relu(x @ params["w1"][e] + params["b1"][e])
        h = relu(h @ params["w2"][e] + params["b2"][e])
        h = relu(h @ params["w3"][e] + params["b3"][e])
        experts.append(h)
    E_net = jnp.stack(experts, axis=1)                          # (B, NE, E)
    outs = []
    for t in range(n_task):
        g = jax.nn.softmax(x @ params["gw"][t] + params["gb"][t], axis=1)
        tower_in = jnp.einsum("bne,bn->be", E_net, g)
        h = relu(tower_in @ params["tw1"][t] + params["tb1"][t])
        h = relu(h @ params["tw2"][t] + params["tb2"][t])
        outs.append(h @ params["tw3"][t] + params["tb3"][t])    # (B, 1)
    return outs


if __name__ == "__main__":
    batch = 8
    feature_dim = 32          # 25 (embedding dims) + 7 continuous features
    expert_dim = 16
    n_expert = 4
    n_task = 2

    key = jax.random.PRNGKey(0)
    kd, kc, kp = jax.random.split(key, 3)
    vocab = jnp.array([n for n, _ in EMB_SPECS], dtype=jnp.int32)
    x_d = jax.random.randint(kd, (batch, len(EMB_SPECS)), 0, 10_000) % vocab[None, :]
    x_c = jax.random.normal(kc, (batch, feature_dim - 25), dtype=jnp.float32)
    params = init_params(kp, feature_dim, expert_dim, n_expert, n_task)

    outs = mmoe_forward(x_d, x_c, params, n_expert=n_expert, n_task=n_task,
                        expert_dim=expert_dim)
    outs = [jax.block_until_ready(o) for o in outs]

    refs = reference_forward(x_d, x_c, params, n_expert=n_expert, n_task=n_task)
    for got, want in zip(outs, refs):
        assert got.shape == (batch, 1)
        # bf16 weights/embeddings + approx reciprocal vs. an all-f32 reference -> relaxed tol.
        err = float(jnp.max(jnp.abs(got - want)))
        assert jnp.allclose(got, want, atol=5e-2, rtol=5e-2), f"max abs err {err}"

    print("KERNEL_OK")
</pallas_src>

<mosaic_0001>
module attributes {stable_mosaic.version = 11 : i64} {
  func.func @_mmoe_kernel(%arg0: i32, %arg1: memref<16x32xbf16, #tpu.memory_space<vmem>>, %arg2: memref<32x256xbf16, #tpu.memory_space<vmem>>, %arg3: memref<1x256xf32, #tpu.memory_space<vmem>>, %arg4: memref<32x8xbf16, #tpu.memory_space<vmem>>, %arg5: memref<1x8xf32, #tpu.memory_space<vmem>>, %arg6: memref<256x128xbf16, #tpu.memory_space<vmem>>, %arg7: memref<1x128xf32, #tpu.memory_space<vmem>>, %arg8: memref<128x128xbf16, #tpu.memory_space<vmem>>, %arg9: memref<1x128xf32, #tpu.memory_space<vmem>>, %arg10: memref<4x128xbf16, #tpu.memory_space<vmem>>, %arg11: memref<256x128xbf16, #tpu.memory_space<vmem>>, %arg12: memref<1x128xf32, #tpu.memory_space<vmem>>, %arg13: memref<128x64xbf16, #tpu.memory_space<vmem>>, %arg14: memref<1x64xf32, #tpu.memory_space<vmem>>, %arg15: memref<64x2xbf16, #tpu.memory_space<vmem>>, %arg16: memref<1x2xf32, #tpu.memory_space<vmem>>, %arg17: memref<16x2xf32, #tpu.memory_space<vmem>>) attributes {dimension_semantics = [#tpu.dimension_semantics<parallel>], iteration_bounds = array<i64: 1>, scalar_prefetch = 0 : i64, scratch_operands = 0 : i64, tpu.core_type = #tpu.core_type<tc>, window_params = [{transform_indices = @transform_0, window_bounds = array<i64: 16, 32>}, {pipeline_mode = #tpu.pipeline_mode<synchronous>, transform_indices = @transform_1, window_bounds = array<i64: 32, 256>}, {pipeline_mode = #tpu.pipeline_mode<synchronous>, transform_indices = @transform_2, window_bounds = array<i64: 1, 256>}, {pipeline_mode = #tpu.pipeline_mode<synchronous>, transform_indices = @transform_3, window_bounds = array<i64: 32, 8>}, {pipeline_mode = #tpu.pipeline_mode<synchronous>, transform_indices = @transform_4, window_bounds = array<i64: 1, 8>}, {pipeline_mode = #tpu.pipeline_mode<synchronous>, transform_indices = @transform_5, window_bounds = array<i64: 256, 128>}, {pipeline_mode = #tpu.pipeline_mode<synchronous>, transform_indices = @transform_6, window_bounds = array<i64: 1, 128>}, {pipeline_mode = #tpu.pipeline_mode<synchronous>, transform_indices = @transform_7, window_bounds = array<i64: 128, 128>}, {pipeline_mode = #tpu.pipeline_mode<synchronous>, transform_indices = @transform_8, window_bounds = array<i64: 1, 128>}, {pipeline_mode = #tpu.pipeline_mode<synchronous>, transform_indices = @transform_9, window_bounds = array<i64: 4, 128>}, {pipeline_mode = #tpu.pipeline_mode<synchronous>, transform_indices = @transform_10, window_bounds = array<i64: 256, 128>}, {pipeline_mode = #tpu.pipeline_mode<synchronous>, transform_indices = @transform_11, window_bounds = array<i64: 1, 128>}, {pipeline_mode = #tpu.pipeline_mode<synchronous>, transform_indices = @transform_12, window_bounds = array<i64: 128, 64>}, {pipeline_mode = #tpu.pipeline_mode<synchronous>, transform_indices = @transform_13, window_bounds = array<i64: 1, 64>}, {pipeline_mode = #tpu.pipeline_mode<synchronous>, transform_indices = @transform_14, window_bounds = array<i64: 64, 2>}, {pipeline_mode = #tpu.pipeline_mode<synchronous>, transform_indices = @transform_15, window_bounds = array<i64: 1, 2>}, {transform_indices = @transform_16, window_bounds = array<i64: 16, 2>}]} {
    %c0 = arith.constant 0 : index
    %c0_0 = arith.constant 0 : index
    %0 = vector.load %arg1[%c0, %c0_0] : memref<16x32xbf16, #tpu.memory_space<vmem>>, vector<16x32xbf16>
    %c0_1 = arith.constant 0 : index
    %c0_2 = arith.constant 0 : index
    %1 = vector.load %arg2[%c0_1, %c0_2] : memref<32x256xbf16, #tpu.memory_space<vmem>>, vector<32x256xbf16>
    %cst = arith.constant dense<0.000000e+00> : vector<16x256xf32>
    %2 = tpu.matmul %0, %1, %cst {dimension_numbers = #tpu.dot_dimension_numbers<[1], [0], [0], [1], [0, 0, 1, 1], [], []>} : vector<16x32xbf16>, vector<32x256xbf16>, vector<16x256xf32> -> vector<16x256xf32>
    %c0_3 = arith.constant 0 : index
    %c0_4 = arith.constant 0 : index
    %3 = vector.load %arg3[%c0_3, %c0_4] : memref<1x256xf32, #tpu.memory_space<vmem>>, vector<1x256xf32>
    %4 = vector.broadcast %3 : vector<1x256xf32> to vector<16x256xf32>
    %5 = arith.addf %2, %4 : vector<16x256xf32>
    %cst_5 = arith.constant 0.000000e+00 : f32
    %6 = vector.broadcast %cst_5 : f32 to vector<16x256xf32>
    %7 = arith.maximumf %5, %6 : vector<16x256xf32>
    %8 = arith.truncf %7 : vector<16x256xf32> to vector<16x256xbf16>
    %c0_6 = arith.constant 0 : index
    %c0_7 = arith.constant 0 : index
    %9 = vector.load %arg4[%c0_6, %c0_7] : memref<32x8xbf16, #tpu.memory_space<vmem>>, vector<32x8xbf16>
    %cst_8 = arith.constant dense<0.000000e+00> : vector<16x8xf32>
    %10 = tpu.matmul %0, %9, %cst_8 {dimension_numbers = #tpu.dot_dimension_numbers<[1], [0], [0], [1], [0, 0, 1, 1], [], []>} : vector<16x32xbf16>, vector<32x8xbf16>, vector<16x8xf32> -> vector<16x8xf32>
    %c0_9 = arith.constant 0 : index
    %c0_10 = arith.constant 0 : index
    %11 = vector.load %arg5[%c0_9, %c0_10] : memref<1x8xf32, #tpu.memory_space<vmem>>, vector<1x8xf32>
    %12 = vector.broadcast %11 : vector<1x8xf32> to vector<16x8xf32>
    %13 = arith.addf %10, %12 : vector<16x8xf32>
    %c0_11 = arith.constant 0 : index
    %c0_12 = arith.constant 0 : index
    %14 = vector.load %arg6[%c0_11, %c0_12] : memref<256x128xbf16, #tpu.memory_space<vmem>>, vector<256x128xbf16>
    %cst_13 = arith.constant dense<0.000000e+00> : vector<16x128xf32>
    %15 = tpu.matmul %8, %14, %cst_13 {dimension_numbers = #tpu.dot_dimension_numbers<[1], [0], [0], [1], [0, 0, 1, 1], [], []>} : vector<16x256xbf16>, vector<256x128xbf16>, vector<16x128xf32> -> vector<16x128xf32>
    %c0_14 = arith.constant 0 : index
    %c0_15 = arith.constant 0 : index
    %16 = vector.load %arg7[%c0_14, %c0_15] : memref<1x128xf32, #tpu.memory_space<vmem>>, vector<1x128xf32>
    %17 = vector.broadcast %16 : vector<1x128xf32> to vector<16x128xf32>
    %18 = arith.addf %15, %17 : vector<16x128xf32>
    %cst_16 = arith.constant 0.000000e+00 : f32
    %19 = vector.broadcast %cst_16 : f32 to vector<16x128xf32>
    %20 = arith.maximumf %18, %19 : vector<16x128xf32>
    %21 = arith.truncf %20 : vector<16x128xf32> to vector<16x128xbf16>
    %c0_17 = arith.constant 0 : index
    %c0_18 = arith.constant 0 : index
    %22 = vector.load %arg8[%c0_17, %c0_18] : memref<128x128xbf16, #tpu.memory_space<vmem>>, vector<128x128xbf16>
    %cst_19 = arith.constant dense<0.000000e+00> : vector<16x128xf32>
    %23 = tpu.matmul %21, %22, %cst_19 {dimension_numbers = #tpu.dot_dimension_numbers<[1], [0], [0], [1], [0, 0, 1, 1], [], []>} : vector<16x128xbf16>, vector<128x128xbf16>, vector<16x128xf32> -> vector<16x128xf32>
    %c0_20 = arith.constant 0 : index
    %c0_21 = arith.constant 0 : index
    %24 = vector.load %arg9[%c0_20, %c0_21] : memref<1x128xf32, #tpu.memory_space<vmem>>, vector<1x128xf32>
    %25 = vector.broadcast %24 : vector<1x128xf32> to vector<16x128xf32>
    %26 = arith.addf %23, %25 : vector<16x128xf32>
    %cst_22 = arith.constant 0.000000e+00 : f32
    %27 = vector.broadcast %cst_22 : f32 to vector<16x128xf32>
    %28 = arith.maximumf %26, %27 : vector<16x128xf32>
    %c0_23 = arith.constant 0 : index
    %c0_24 = arith.constant 0 : index
    %29 = vector.load %arg10[%c0_23, %c0_24] : memref<4x128xbf16, #tpu.memory_space<vmem>>, vector<4x128xbf16>
    %30 = vector.extract_strided_slice %13 {offsets = [0, 0], sizes = [16, 4], strides = [1, 1]} : vector<16x8xf32> to vector<16x4xf32>
    %cst_25 = arith.constant dense<0xFF800000> : vector<16xf32>
    %31 = vector.multi_reduction <maximumf>, %30, %cst_25 [1] : vector<16x4xf32> to vector<16xf32>
    %32 = vector.shape_cast %31 : vector<16xf32> to vector<16x1xf32>
    %33 = vector.broadcast %32 : vector<16x1xf32> to vector<16x4xf32>
    %34 = arith.subf %30, %33 : vector<16x4xf32>
    %35 = math.exp %34 : vector<16x4xf32>
    %cst_26 = arith.constant dense<0.000000e+00> : vector<16xf32>
    %36 = vector.multi_reduction <add>, %35, %cst_26 [1] : vector<16x4xf32> to vector<16xf32>
    %37 = vector.shape_cast %36 : vector<16xf32> to vector<16x1xf32>
    %38 = tpu.reciprocal %37 {approx = true} : vector<16x1xf32> -> vector<16x1xf32>
    %39 = vector.broadcast %38 : vector<16x1xf32> to vector<16x4xf32>
    %40 = arith.mulf %35, %39 : vector<16x4xf32>
    %41 = arith.truncf %40 : vector<16x4xf32> to vector<16x4xbf16>
    %cst_27 = arith.constant dense<0.000000e+00> : vector<16x128xf32>
    %42 = tpu.matmul %41, %29, %cst_27 {dimension_numbers = #tpu.dot_dimension_numbers<[1], [0], [0], [1], [0, 0, 1, 1], [], []>} : vector<16x4xbf16>, vector<4x128xbf16>, vector<16x128xf32> -> vector<16x128xf32>
    %43 = arith.mulf %42, %28 : vector<16x128xf32>
    %44 = vector.extract_strided_slice %13 {offsets = [0, 4], sizes = [16, 4], strides = [1, 1]} : vector<16x8xf32> to vector<16x4xf32>
    %cst_28 = arith.constant dense<0xFF800000> : vector<16xf32>
    %45 = vector.multi_reduction <maximumf>, %44, %cst_28 [1] : vector<16x4xf32> to vector<16xf32>
    %46 = vector.shape_cast %45 : vector<16xf32> to vector<16x1xf32>
    %47 = vector.broadcast %46 : vector<16x1xf32> to vector<16x4xf32>
    %48 = arith.subf %44, %47 : vector<16x4xf32>
    %49 = math.exp %48 : vector<16x4xf32>
    %cst_29 = arith.constant dense<0.000000e+00> : vector<16xf32>
    %50 = vector.multi_reduction <add>, %49, %cst_29 [1] : vector<16x4xf32> to vector<16xf32>
    %51 = vector.shape_cast %50 : vector<16xf32> to vector<16x1xf32>
    %52 = tpu.reciprocal %51 {approx = true} : vector<16x1xf32> -> vector<16x1xf32>
    %53 = vector.broadcast %52 : vector<16x1xf32> to vector<16x4xf32>
    %54 = arith.mulf %49, %53 : vector<16x4xf32>
    %55 = arith.truncf %54 : vector<16x4xf32> to vector<16x4xbf16>
    %cst_30 = arith.constant dense<0.000000e+00> : vector<16x128xf32>
    %56 = tpu.matmul %55, %29, %cst_30 {dimension_numbers = #tpu.dot_dimension_numbers<[1], [0], [0], [1], [0, 0, 1, 1], [], []>} : vector<16x4xbf16>, vector<4x128xbf16>, vector<16x128xf32> -> vector<16x128xf32>
    %57 = arith.mulf %56, %28 : vector<16x128xf32>
    %58 = tpu.concatenate %43, %57 in 1 : vector<16x128xf32>, vector<16x128xf32> -> vector<16x256xf32>
    %59 = arith.truncf %58 : vector<16x256xf32> to vector<16x256xbf16>
    %c0_31 = arith.constant 0 : index
    %c0_32 = arith.constant 0 : index
    %60 = vector.load %arg11[%c0_31, %c0_32] : memref<256x128xbf16, #tpu.memory_space<vmem>>, vector<256x128xbf16>
    %cst_33 = arith.constant dense<0.000000e+00> : vector<16x128xf32>
    %61 = tpu.matmul %59, %60, %cst_33 {dimension_numbers = #tpu.dot_dimension_numbers<[1], [0], [0], [1], [0, 0, 1, 1], [], []>} : vector<16x256xbf16>, vector<256x128xbf16>, vector<16x128xf32> -> vector<16x128xf32>
    %c0_34 = arith.constant 0 : index
    %c0_35 = arith.constant 0 : index
    %62 = vector.load %arg12[%c0_34, %c0_35] : memref<1x128xf32, #tpu.memory_space<vmem>>, vector<1x128xf32>
    %63 = vector.broadcast %62 : vector<1x128xf32> to vector<16x128xf32>
    %64 = arith.addf %61, %63 : vector<16x128xf32>
    %cst_36 = arith.constant 0.000000e+00 : f32
    %65 = vector.broadcast %cst_36 : f32 to vector<16x128xf32>
    %66 = arith.maximumf %64, %65 : vector<16x128xf32>
    %67 = arith.truncf %66 : vector<16x128xf32> to vector<16x128xbf16>
    %c0_37 = arith.constant 0 : index
    %c0_38 = arith.constant 0 : index
    %68 = vector.load %arg13[%c0_37, %c0_38] : memref<128x64xbf16, #tpu.memory_space<vmem>>, vector<128x64xbf16>
    %cst_39 = arith.constant dense<0.000000e+00> : vector<16x64xf32>
    %69 = tpu.matmul %67, %68, %cst_39 {dimension_numbers = #tpu.dot_dimension_numbers<[1], [0], [0], [1], [0, 0, 1, 1], [], []>} : vector<16x128xbf16>, vector<128x64xbf16>, vector<16x64xf32> -> vector<16x64xf32>
    %c0_40 = arith.constant 0 : index
    %c0_41 = arith.constant 0 : index
    %70 = vector.load %arg14[%c0_40, %c0_41] : memref<1x64xf32, #tpu.memory_space<vmem>>, vector<1x64xf32>
    %71 = vector.broadcast %70 : vector<1x64xf32> to vector<16x64xf32>
    %72 = arith.addf %69, %71 : vector<16x64xf32>
    %cst_42 = arith.constant 0.000000e+00 : f32
    %73 = vector.broadcast %cst_42 : f32 to vector<16x64xf32>
    %74 = arith.maximumf %72, %73 : vector<16x64xf32>
    %75 = arith.truncf %74 : vector<16x64xf32> to vector<16x64xbf16>
    %c0_43 = arith.constant 0 : index
    %c0_44 = arith.constant 0 : index
    %76 = vector.load %arg15[%c0_43, %c0_44] : memref<64x2xbf16, #tpu.memory_space<vmem>>, vector<64x2xbf16>
    %cst_45 = arith.constant dense<0.000000e+00> : vector<16x2xf32>
    %77 = tpu.matmul %75, %76, %cst_45 {dimension_numbers = #tpu.dot_dimension_numbers<[1], [0], [0], [1], [0, 0, 1, 1], [], []>} : vector<16x64xbf16>, vector<64x2xbf16>, vector<16x2xf32> -> vector<16x2xf32>
    %c0_46 = arith.constant 0 : index
    %c0_47 = arith.constant 0 : index
    %78 = vector.load %arg16[%c0_46, %c0_47] : memref<1x2xf32, #tpu.memory_space<vmem>>, vector<1x2xf32>
    %79 = vector.broadcast %78 : vector<1x2xf32> to vector<16x2xf32>
    %80 = arith.addf %77, %79 : vector<16x2xf32>
    %c0_48 = arith.constant 0 : index
    %c0_49 = arith.constant 0 : index
    %81 = vector.load %arg17[%c0_48, %c0_49] : memref<16x2xf32, #tpu.memory_space<vmem>>, vector<16x2xf32>
    tpu.vector_store %arg17[%c0_48, %c0_49], %80 {strides = array<i32>} : memref<16x2xf32, #tpu.memory_space<vmem>>, vector<16x2xf32>,
    return
  }
  func.func @transform_0(%arg0: i32) -> (i32, i32) {
    %c0_i32 = arith.constant 0 : i32
    %c0_i32_0 = arith.constant 0 : i32
    return %arg0, %c0_i32 : i32, i32
  }
  func.func @transform_1(%arg0: i32) -> (i32, i32) {
    %c0_i32 = arith.constant 0 : i32
    %c0_i32_0 = arith.constant 0 : i32
    %c0_i32_1 = arith.constant 0 : i32
    return %c0_i32, %c0_i32_0 : i32, i32
  }
  func.func @transform_2(%arg0: i32) -> (i32, i32) {
    %c0_i32 = arith.constant 0 : i32
    %c0_i32_0 = arith.constant 0 : i32
    %c0_i32_1 = arith.constant 0 : i32
    return %c0_i32, %c0_i32_0 : i32, i32
  }
  func.func @transform_3(%arg0: i32) -> (i32, i32) {
    %c0_i32 = arith.constant 0 : i32
    %c0_i32_0 = arith.constant 0 : i32
    %c0_i32_1 = arith.constant 0 : i32
    return %c0_i32, %c0_i32_0 : i32, i32
  }
  func.func @transform_4(%arg0: i32) -> (i32, i32) {
    %c0_i32 = arith.constant 0 : i32
    %c0_i32_0 = arith.constant 0 : i32
    %c0_i32_1 = arith.constant 0 : i32
    return %c0_i32, %c0_i32_0 : i32, i32
  }
  func.func @transform_5(%arg0: i32) -> (i32, i32) {
    %c0_i32 = arith.constant 0 : i32
    %c0_i32_0 = arith.constant 0 : i32
    %c0_i32_1 = arith.constant 0 : i32
    return %c0_i32, %c0_i32_0 : i32, i32
  }
  func.func @transform_6(%arg0: i32) -> (i32, i32) {
    %c0_i32 = arith.constant 0 : i32
    %c0_i32_0 = arith.constant 0 : i32
    %c0_i32_1 = arith.constant 0 : i32
    return %c0_i32, %c0_i32_0 : i32, i32
  }
  func.func @transform_7(%arg0: i32) -> (i32, i32) {
    %c0_i32 = arith.constant 0 : i32
    %c0_i32_0 = arith.constant 0 : i32
    %c0_i32_1 = arith.constant 0 : i32
    return %c0_i32, %c0_i32_0 : i32, i32
  }
  func.func @transform_8(%arg0: i32) -> (i32, i32) {
    %c0_i32 = arith.constant 0 : i32
    %c0_i32_0 = arith.constant 0 : i32
    %c0_i32_1 = arith.constant 0 : i32
    return %c0_i32, %c0_i32_0 : i32, i32
  }
  func.func @transform_9(%arg0: i32) -> (i32, i32) {
    %c0_i32 = arith.constant 0 : i32
    %c0_i32_0 = arith.constant 0 : i32
    %c0_i32_1 = arith.constant 0 : i32
    return %c0_i32, %c0_i32_0 : i32, i32
  }
  func.func @transform_10(%arg0: i32) -> (i32, i32) {
    %c0_i32 = arith.constant 0 : i32
    %c0_i32_0 = arith.constant 0 : i32
    %c0_i32_1 = arith.constant 0 : i32
    return %c0_i32, %c0_i32_0 : i32, i32
  }
  func.func @transform_11(%arg0: i32) -> (i32, i32) {
    %c0_i32 = arith.constant 0 : i32
    %c0_i32_0 = arith.constant 0 : i32
    %c0_i32_1 = arith.constant 0 : i32
    return %c0_i32, %c0_i32_0 : i32, i32
  }
  func.func @transform_12(%arg0: i32) -> (i32, i32) {
    %c0_i32 = arith.constant 0 : i32
    %c0_i32_0 = arith.constant 0 : i32
    %c0_i32_1 = arith.constant 0 : i32
    return %c0_i32, %c0_i32_0 : i32, i32
  }
  func.func @transform_13(%arg0: i32) -> (i32, i32) {
    %c0_i32 = arith.constant 0 : i32
    %c0_i32_0 = arith.constant 0 : i32
    %c0_i32_1 = arith.constant 0 : i32
    return %c0_i32, %c0_i32_0 : i32, i32
  }
  func.func @transform_14(%arg0: i32) -> (i32, i32) {
    %c0_i32 = arith.constant 0 : i32
    %c0_i32_0 = arith.constant 0 : i32
    %c0_i32_1 = arith.constant 0 : i32
    return %c0_i32, %c0_i32_0 : i32, i32
  }
  func.func @transform_15(%arg0: i32) -> (i32, i32) {
    %c0_i32 = arith.constant 0 : i32
    %c0_i32_0 = arith.constant 0 : i32
    %c0_i32_1 = arith.constant 0 : i32
    return %c0_i32, %c0_i32_0 : i32, i32
  }
  func.func @transform_16(%arg0: i32) -> (i32, i32) {
    %c0_i32 = arith.constant 0 : i32
    %c0_i32_0 = arith.constant 0 : i32
    return %arg0, %c0_i32 : i32, i32
  }
}

</mosaic_0001>

<bundles_post_ra>
// kernel: tpu_custom_call.1
= control target key start
LH: loop header
LB: loop body
LE: loop exit
PB: predicated region body
PF: predicated region fallthrough
CT: control target
= control target key end

     0   :  { %s1907_s0 = inlined_call_operand.hbm [shape: bf16[16,32], index: 0, kind: input, shape index: {}]   ;;  %s1908_s1 = inlined_call_operand.hbm [shape: bf16[32,256], index: 1, kind: input, shape index: {}]   ;;  %s1909_s2 = inlined_call_operand.hbm [shape: f32[1,256], index: 2, kind: input, shape index: {}]   ;;  %s1910_s3 = inlined_call_operand.vmem [shape: bf16[32,8], index: 3, kind: input, shape index: {}]   ;;  %s1911_s4 = inlined_call_operand.vmem [shape: f32[1,8], index: 4, kind: input, shape index: {}]   ;;  %s1912_s5 = inlined_call_operand.vmem [shape: bf16[256,128], index: 5, kind: input, shape index: {}]   ;;  %s1913_s6 = inlined_call_operand.hbm [shape: f32[1,128], index: 6, kind: input, shape index: {}]   ;;  %s1914_s7 = inlined_call_operand.hbm [shape: bf16[128,128], index: 7, kind: input, shape index: {}]   ;;  %s1915_s8 = inlined_call_operand.hbm [shape: f32[1,128], index: 8, kind: input, shape index: {}]   ;;  %s1916_s9 = inlined_call_operand.vmem [shape: bf16[4,128], index: 9, kind: input, shape index: {}]   ;;  %s1917_s10 = inlined_call_operand.hbm [shape: bf16[256,128], index: 10, kind: input, shape index: {}]   ;;  %s1918_s11 = inlined_call_operand.vmem [shape: f32[1,128], index: 11, kind: input, shape index: {}]   ;;  %s1919_s12 = inlined_call_operand.vmem [shape: bf16[128,64], index: 12, kind: input, shape index: {}]   ;;  %s1920_s13 = inlined_call_operand.vmem [shape: f32[1,64], index: 13, kind: input, shape index: {}]   ;;  %s1921_s14 = inlined_call_operand.vmem [shape: bf16[64,2], index: 14, kind: input, shape index: {}]   ;;  %s1922_s15 = inlined_call_operand.vmem [shape: f32[1,2], index: 15, kind: input, shape index: {}]   ;;  %s1923_s16 = inlined_call_operand.vmem [shape: f32[16,2], index: 16, kind: output, shape index: {}]  }
   0x1   :  { %1924 = sst [smem:[#allocation17_spill]] %s1907_s0 }
   0x2   :  { %21 = vsyncpa [#allocation3], 0 }
   0x3   :  { %22 = vsyncpa [#allocation5], 0 }
   0x4   :  { %23 = vsyncpa [#allocation8], 0 }
   0x5   :  { %24 = vsyncpa [#allocation11], 0  ;;  %s1599_s21 = smov [#allocation4]  }
   0x6   :  { %s42_s22 = sshll.u32 %s1599_s21, 4  ;;  %s43_s22 = int_to_ptr.vmem [resolvable:$true] %s42_s22 }
   0x7   :  { %s1459_s23 = scalar_lea.vmem %s43_s22, 512  ;;  %p1464_p1 = scmp.lt.s32.totalorder %s43_s22, %s43_s22 }
   0x8   :  { %p1460_p0 = scmp.ne.s32.totalorder %s43_s22, %s1459_s23  ;;  %p1465_p2 = scmp.lt.s32.totalorder %s1459_s23, %s1459_s23 }
   0xa   :  { %p1466_p3 = por %p1465_p2, %p1464_p1 }
   0xc   :  { %p1467_p4 = pnand %p1466_p3, %p1460_p0 }
   0xe   :  { %1470 = shalt.err (!%p1467_p4)
}
   0xf   :  { %s1600_s24 = smov 128   ;;  %s1601_s25 = smov 8  }
  0x10   :  { %48 = dma.hbm_to_vmem [thread:$0]  %s1908_s1, 512, %s43_s22, [#allocation5], %s1600_s24, %s1600_s24, %s1601_s25  }
  0x11   :  { %s1602_s28 = smov [#allocation7]   ;;  %s1603_s30 = smov [#allocation10]  }
  0x12   :  { %s71_s29 = sshll.u32 %s1602_s28, 4  ;;  %s93_s0 = sshll.u32 %s1603_s30, 4  ;;  %s72_s29 = int_to_ptr.vmem [resolvable:$true] %s71_s29  ;;  %s94_s0 = int_to_ptr.vmem [resolvable:$true] %s93_s0 }
  0x13   :  { %s1479_s17 = scalar_lea.vmem %s72_s29, 16  ;;  %s1483_s18 = scalar_lea.vmem %s72_s29, 32 }
  0x14   :  { %p1480_p5 = scmp.ne.s32.totalorder %s72_s29, %s1479_s17  ;;  %p1484_p6 = scmp.lt.s32.totalorder %s72_s29, %s72_s29 }
  0x15   :  { %p1485_p7 = scmp.lt.s32.totalorder %s1483_s18, %s1479_s17 }
  0x17   :  { %p1486_p8 = por %p1485_p7, %p1484_p6 }
  0x19   :  { %p1487_p9 = pnand %p1486_p8, %p1480_p5 }
  0x1b   :  { %1490 = shalt.err (!%p1487_p9)
}
  0x1c   :  { %74 = dma.hbm_to_vmem [thread:$0]  %s1913_s6, 16, %s72_s29, [#allocation8]  }
  0x1d   :  { %s1499_s21 = scalar_lea.vmem %s94_s0, 16  ;;  %s1503_s1 = scalar_lea.vmem %s94_s0, 32 }
  0x1e   :  { %p1500_p10 = scmp.ne.s32.totalorder %s94_s0, %s1499_s21  ;;  %p1504_p11 = scmp.lt.s32.totalorder %s94_s0, %s94_s0 }
  0x1f   :  { %p1505_p12 = scmp.lt.s32.totalorder %s1503_s1, %s1499_s21 }
  0x21   :  { %p1506_p13 = por %p1505_p12, %p1504_p11 }
  0x23   :  { %p1507_p0 = pnand %p1506_p13, %p1500_p10 }
  0x25   :  { %1510 = shalt.err (!%p1507_p0)
}
  0x26   :  { %96 = dma.hbm_to_vmem [thread:$0]  %s1915_s8, 16, %s94_s0, [#allocation11]  }
  0x27   :  { %s1604_s24 = smov [#allocation2]  }
  0x28   :  { %s30_s25 = sshll.u32 %s1604_s24, 4  ;;  %s31_s25 = int_to_ptr.vmem [resolvable:$true] %s30_s25 }
  0x29   :  { %s1519_s26 = scalar_lea.vmem %s31_s25, 128  ;;  %p1524_p2 = scmp.lt.s32.totalorder %s31_s25, %s31_s25 }
  0x2a   :  { %p1520_p1 = scmp.ne.s32.totalorder %s31_s25, %s1519_s26  ;;  %p1525_p3 = scmp.lt.s32.totalorder %s1519_s26, %s1519_s26 }
  0x2c   :  { %p1526_p4 = por %p1525_p3, %p1524_p2 }
  0x2e   :  { %p1527_p5 = pnand %p1526_p4, %p1520_p1 }
  0x30   :  { %1530 = shalt.err (!%p1527_p5)
}
  0x31   :  { %s1605_s6 = smov 64   ;;  %s1606_s27 = smov 4  }
  0x32   :  { %s1925_s30 = sld [smem:[#allocation17_spill]]  ;;  %s1607_s8 = smov [#allocation6]  }
  0x33   :  { %s55_s0 = sshll.u32 %s1607_s8, 4  ;;  %s1608_s17 = smov [#allocation9]   ;;  %s56_s0 = int_to_ptr.vmem [resolvable:$true] %s55_s0 }
  0x34   :  { %s80_s18 = sshll.u32 %s1608_s17, 4  ;;  %s1539_s19 = scalar_lea.vmem %s56_s0, 32  ;;  %s81_s18 = int_to_ptr.vmem [resolvable:$true] %s80_s18 }
  0x35   :  { %p1540_p6 = scmp.ne.s32.totalorder %s56_s0, %s1539_s19  ;;  %p1544_p7 = scmp.lt.s32.totalorder %s56_s0, %s56_s0 }
  0x36   :  { %p1545_p8 = scmp.lt.s32.totalorder %s1539_s19, %s1539_s19 }
  0x38   :  { %36 = dma.hbm_to_vmem [thread:$0]  %s1925_s30, 128, %s31_s25, [#allocation3], %s1605_s6, %s1605_s6, %s1606_s27  }
  0x39   :  { %p1546_p9 = por %p1545_p8, %p1544_p7 }
  0x3b   :  { %p1547_p10 = pnand %p1546_p9, %p1540_p6 }
  0x3d   :  { %1550 = shalt.err (!%p1547_p10)
}
  0x3e   :  { %58 = dma.hbm_to_vmem [thread:$0]  %s1909_s2, 32, %s56_s0, [#allocation5]  }
  0x3f   :  { %s1559_s1 = scalar_lea.vmem %s81_s18, 1024  ;;  %p1564_p12 = scmp.lt.s32.totalorder %s81_s18, %s81_s18 }
  0x40   :  { %p1560_p11 = scmp.ne.s32.totalorder %s81_s18, %s1559_s1  ;;  %p1565_p13 = scmp.lt.s32.totalorder %s1559_s1, %s1559_s1 }
  0x42   :  { %p1566_p0 = por %p1565_p13, %p1564_p12 }
  0x44   :  { %p1567_p1 = pnand %p1566_p0, %p1560_p11 }
  0x46   :  { %1570 = shalt.err (!%p1567_p1)
}
  0x47   :  { %86 = dma.hbm_to_vmem [thread:$0]  %s1914_s7, 1024, %s81_s18, [#allocation8], %s1605_s6, %s1605_s6, %s1606_s27  }
  0x48   :  { %s1609_s24 = smov [#allocation12]  }
  0x49   :  { %s104_s25 = sshll.u32 %s1609_s24, 4  ;;  %s105_s25 = int_to_ptr.vmem [resolvable:$true] %s104_s25 }
  0x4a   :  { %s1579_s26 = scalar_lea.vmem %s105_s25, 2048  ;;  %p1584_p3 = scmp.lt.s32.totalorder %s105_s25, %s105_s25 }
  0x4b   :  { %p1580_p2 = scmp.ne.s32.totalorder %s105_s25, %s1579_s26  ;;  %p1585_p4 = scmp.lt.s32.totalorder %s1579_s26, %s1579_s26 }
  0x4d   :  { %p1586_p5 = por %p1585_p4, %p1584_p3 }
  0x4f   :  { %p1587_p6 = pnand %p1586_p5, %p1580_p2 }
  0x51   :  { %1590 = shalt.err (!%p1587_p6)
}
  0x52   :  { %110 = dma.hbm_to_vmem [thread:$0]  %s1917_s10, 2048, %s105_s25, [#allocation11], %s1605_s6, %s1605_s6, %s1606_s27  }
  0x53   :  { %1591 = dma.done.wait [#allocation3], 128  }
  0x54   :  { %1592 = vsyncadd [#allocation3], 4294967168 }
  0x55   :  { %1593 = dma.done.wait [#allocation5], 544  }
  0x56   :  { %1594 = vsyncadd [#allocation5], 4294966752 }
  0x57   :  { %1595 = dma.done.wait [#allocation8], 1040  }
  0x58   :  { %1596 = vsyncadd [#allocation8], 4294966256 }
  0x59   :  { %1597 = dma.done.wait [#allocation11], 2064  }
  0x5a   :  { %1598 = vsyncadd [#allocation11], 4294965232  ;;  %v1610_v0 = vmov 0   ;;  %v1374_v1 = vld [vmem:[#allocation4 + $0x14] ss:$8 sps:$4 sm:$0xff]   ;;  %v1381_v6 = vld [vmem:[%s1910_s3 + $0x8] sm:$0xff]   ;;  %v151_v25 = vlaneseq }
  0x5b   :  { %222 = vmatprep.mubr.bf16.mxu1 %v1610_v0  ;;  %v1376_v2 = vld [vmem:[#allocation4 + $0x10] ss:$8 sps:$4 sm:$0xff]   ;;  %202 = vmatprep.subr.bf16.mxu1 %v1374_v1  ;;  %v1377_v3 = vld [vmem:[#allocation4 + $0x4] ss:$8 sps:$4 sm:$0xff]   ;;  %v1379_v4 = vld [vmem:[#allocation4] ss:$8 sps:$4 sm:$0xff]  }
  0x5c   :  { %203 = vmatpush1.bf16.msra.mxu1 %v1376_v2  ;;  %v1380_v5 = vld [vmem:[#allocation2] sm:$0xff]   ;;  %v1383_v7 = vld [vmem:[%s1912_s5 + $0x78] sm:$0xff]   ;;  %vm186_vm0 = vcmask 261120   ;;  %v1611_v9 = vmov 0.0   ;;  %v1385_v10 = vld [vmem:[%s1912_s5 + $0x70] sm:$0xff]   ;;  %vm1612_vm1 = vmmov 0  }
  0x5d   :  { %204 = vmatprep.subr.bf16.mxu1 %v1377_v3  ;;  %v1384_v8 = vld [vmem:[%s1912_s5 + $0x38] sm:$0xff]   ;;  %1216 = vmatprep.subr.bf16.mxu0 %v1383_v7  ;;  %v1386_v11 = vld [vmem:[%s1912_s5 + $0x30] sm:$0xff]   ;;  %v1387_v12 = vld [vmem:[%s1912_s5 + $0x68] sm:$0xff]   ;;  %v152_v26 = vshrl.u32 %v151_v25, 7  ;;  %vm671_vm2 = vcmask 64544   ;;  %vm597_vm3 = vcmask 31744  }
  0x5e   :  { %1217 = vmatpush3.bf16.msra.mxu0 %v1384_v8  ;;  %v1382_v13 = vld [vmem:[%s1910_s3] sm:$0xff]   ;;  %v1388_v14 = vld [vmem:[%s1912_s5 + $0x28] sm:$0xff]   ;;  %v1391_v17 = vld [vmem:[%s1912_s5 + $0x58] sm:$0xff]   ;;  %vm624_vm4 = vcmask 1041408   ;;  %vm1087_vm5 = vcmask 523264   ;;  %vm1132_vm6 = vcmask 15360  }
  0x5f   :  { %1218 = vmatprep.subr.bf16.mxu0 %v1385_v10  ;;  %v1389_v15 = vld [vmem:[%s1912_s5 + $0x60] sm:$0xff]   ;;  %v1392_v18 = vld [vmem:[%s1912_s5 + $0x18] sm:$0xff]   ;;  %v1393_v19 = vld [vmem:[%s1912_s5 + $0x50] sm:$0xff]   ;;  %v157_v27 = vsub.s32 1, %v152_v26  ;;  %v153_v28 = vsub.s32 0, %v152_v26 }
  0x60   :  { %205 = vmatpush1.bf16.msra.mxu1 %v1379_v4  ;;  %v1390_v16 = vld [vmem:[%s1912_s5 + $0x20] sm:$0xff]   ;;  %v1394_v20 = vld [vmem:[%s1912_s5 + $0x10] sm:$0xff]   ;;  %v1395_v21 = vld [vmem:[%s1912_s5 + $0x48] sm:$0xff]  }
  0x61   :  { %1287 = vmatprep.subr.bf16.mxu1 %v1611_v9  ;;  %v1396_v22 = vld [vmem:[%s1912_s5 + $0x8] sm:$0xff]   ;;  %v1397_v23 = vld [vmem:[%s1912_s5 + $0x40] sm:$0xff]   ;;  %v1401_v58 = vld [vmem:[#allocation9 + $0x28] sm:$0xff]  }
  0x62   :  { %1219 = vmatpush3.bf16.msra.mxu0 %v1386_v11  ;;  %v1398_v24 = vld [vmem:[%s1912_s5] sm:$0xff]   ;;  %v149_v29 = vld [vmem:[#allocation6] sm:$0x3]  ;;  %v1402_v59 = vld [vmem:[#allocation9 + $0x20] sm:$0xff]  }
  0x63   :  { %1148 = vmatmul.mubr.msk.bf16.vlgmr.msra.gmra.mxu1 %vm186_vm0, %v1380_v5  ;;  %1220 = vmatprep.subr.bf16.mxu0 %v1387_v12  ;;  %v158_v31 = vrot.slane %v149_v29, %v157_v27  ;;  %v154_v32 = vrot.slane %v149_v29, %v153_v28  ;;  %v1149_v39 = vld [vmem:[%s1911_s4] ss:$0 sm:$0xff]  ;;  %v1399_v56 = vld [vmem:[#allocation9 + $0x38] sm:$0xff]   ;;  %v1405_v62 = vld [vmem:[#allocation9 + $0x8] sm:$0xff]   ;;  %s1613_s4 = smov 124  }
  0x64   :  { %1288 = vmatpush3.bf16.msra.mxu1 %v1381_v6  ;;  %1291 = vmatprep.mubr.msk.bf16.mxu1 %vm1612_vm1, %v1611_v9  ;;  %v1400_v57 = vld [vmem:[#allocation9 + $0x30] sm:$0xff]   ;;  %v1403_v60 = vld [vmem:[#allocation9 + $0x18] sm:$0xff]   ;;  %v1406_v63 = vld [vmem:[#allocation9] sm:$0xff]  }
  0x65   :  { %1289 = vmatprep.subr.bf16.mxu1 %v1611_v9  ;;  %v1404_v61 = vld [vmem:[#allocation9 + $0x10] sm:$0xff]  }
  0x66   :  { %1221 = vmatpush3.bf16.msra.mxu0 %v1388_v14 }
  0x67   :  { %1222 = vmatprep.subr.bf16.mxu0 %v1389_v15 }
  0x68   :  { %1290 = vmatpush3.bf16.msra.mxu1 %v1382_v13  ;;  %v1153_v13 = vld [vmem:[#allocation7] ss:$0 sm:$0xff] }
  0x69   :  { %1295 = vmatprep.subr.bf16.mxu1 %v1611_v9 }
  0x6a   :  { %1223 = vmatpush3.bf16.msra.mxu0 %v1390_v16 }
  0x6b   :  { %1292 = vmatmul.mubr.msk.bf16.vlgmr.msra.gmra.mxu1 %vm186_vm0, %v1380_v5  ;;  %1224 = vmatprep.subr.bf16.mxu0 %v1391_v17 }
  0x6c   :  { %1311 = vmatprep.mubr.msk.bf16.mxu1 %vm1612_vm1, %v1611_v9  ;;  %1296 = vmatpush3.bf16.msra.mxu1 %v1399_v56 }
  0x6d   :  { %1297 = vmatprep.subr.bf16.mxu1 %v1611_v9 }
  0x6e   :  { %1225 = vmatpush3.bf16.msra.mxu0 %v1392_v18 }
  0x6f   :  { %1226 = vmatprep.subr.bf16.mxu0 %v1393_v19 }
  0x70   :  { %1298 = vmatpush3.bf16.msra.mxu1 %v1400_v57  ;;  %v1407_v57 = vld [vmem:[#allocation12 + $0x78] sm:$0xff]  }
  0x71   :  { %1299 = vmatprep.subr.bf16.mxu1 %v1611_v9 }
  0x72   :  { %1227 = vmatpush3.bf16.msra.mxu0 %v1394_v20 }
  0x73   :  { %1228 = vmatprep.subr.bf16.mxu0 %v1395_v21 }
  0x74   :  { %1300 = vmatpush3.bf16.msra.mxu1 %v1401_v58  ;;  %v1408_v58 = vld [vmem:[#allocation12 + $0x38] sm:$0xff]  }
  0x75   :  { %1301 = vmatprep.subr.bf16.mxu1 %v1611_v9 }
  0x76   :  { %1229 = vmatpush3.bf16.msra.mxu0 %v1396_v22 }
  0x77   :  { %1230 = vmatprep.subr.bf16.mxu0 %v1397_v23 }
  0x78   :  { %1302 = vmatpush3.bf16.msra.mxu1 %v1402_v59  ;;  %v1409_v59 = vld [vmem:[#allocation12 + $0x70] sm:$0xff]  }
  0x79   :  { %1303 = vmatprep.subr.bf16.mxu1 %v1611_v9 }
  0x7a   :  { %1231 = vmatpush3.bf16.msra.mxu0 %v1398_v24 }
  0x7b   :  { %1315 = vmatprep.subr.bf16.mxu0 %v1611_v9 }
  0x7c   :  { %1304 = vmatpush3.bf16.msra.mxu1 %v1403_v60  ;;  %v1410_v60 = vld [vmem:[#allocation12 + $0x30] sm:$0xff]  }
  0x7d   :  { %1305 = vmatprep.subr.bf16.mxu1 %v1611_v9 }
  0x80   :  { %1306 = vmatpush3.bf16.msra.mxu1 %v1404_v61  ;;  %v1411_v61 = vld [vmem:[#allocation12 + $0x68] sm:$0xff]  }
  0x81   :  { %1307 = vmatprep.subr.bf16.mxu1 %v1611_v9 }
  0x84   :  { %1308 = vmatpush3.bf16.msra.mxu1 %v1405_v62  ;;  %v1412_v62 = vld [vmem:[#allocation12 + $0x28] sm:$0xff]  }
  0x85   :  { %1309 = vmatprep.subr.bf16.mxu1 %v1611_v9 }
  0x88   :  { %1310 = vmatpush3.bf16.msra.mxu1 %v1406_v63  ;;  %v1413_v63 = vld [vmem:[#allocation12 + $0x60] sm:$0xff]  }
  0x89   :  { %1321 = vmatprep.subr.bf16.mxu1 %v1611_v9 }
 0x123   :  { %v224_v30 = vpop.f32.mrf.mxu1 }
 0x124   :  { %v225_v37 = vadd.f32 %v224_v30, %v154_v32 }
 0x125   :  { %v226_v33 = vpop.f32.mrf.mxu1 }
 0x126   :  { %v227_v35 = vadd.f32 %v226_v33, %v158_v31  ;;  %v233_v46 = vmax.f32 %v225_v37, 0.0 }
 0x127   :  { %v228_v34 = vpop.f32.mrf.mxu1 }
 0x128   :  { %v229_v36 = vadd.f32 %v228_v34, %v154_v32  ;;  %v234_v43 = vmax.f32 %v227_v35, 0.0 }
 0x129   :  { %v230_v38 = vpop.f32.mrf.mxu1 }
 0x12a   :  { %v231_v40 = vadd.f32 %v230_v38, %v158_v31  ;;  %v235_v41 = vmax.f32 %v229_v36, 0.0  ;;  %v596_v36 = vld [vmem:[%s1916_s9] sm:$0x3] }
 0x12b   :  { %v296_v42 = vpop.f32.mrf.mxu1  ;;  %v626_v37 = vsel %vm624_vm4, %v596_v36, 0  ;;  %v1430_v36 = vld [vmem:[%s1919_s12] sm:$0xff]  }
 0x12c   :  { %v236_v44 = vmax.f32 %v231_v40, 0.0  ;;  %v1796_v45 = vadd.f32 %v1149_v39, %v296_v42  ;;  %v237_v50 = vpack.c.bf16 %v235_v41, %v233_v46 }
 0x12d   :  { %v1293_v47 = vpop.f32.mrf.mxu1 }
 0x12e   :  { %v672_v48 = vsel %vm671_vm2, %v1796_v45, -inf  ;;  %v238_v49 = vpack.c.bf16 %v236_v44, %v234_v43  ;;  %v598_v55 = vsel %vm597_vm3, %v1796_v45, -inf }
 0x12f   :  { %673 = vmax.xlane.f32.xlu0 %v672_v48  ;;  %v299_v51 = vpop.f32.mrf.mxu1 }
 0x130   :  { %v1799_v52 = vadd.f32 %v1149_v39, %v299_v51  ;;  %470 = vmatprep.mubr.bf16.mxu0 %v238_v49 }
 0x131   :  { %v1294_v53 = vpop.f32.mrf.mxu1  ;;  %471 = vmatmul.mubr.bf16.vlgmr.msra.gmra.mxu0 %v237_v50 }
 0x132   :  { %v675_v54 = vsel %vm671_vm2, %v1799_v52, -inf  ;;  %1317 = vmatprep.mubr.msk.bf16.mxu0 %vm1612_vm1, %v1611_v9  ;;  %v601_v10 = vsel %vm597_vm3, %v1799_v52, -inf  ;;  %1316 = vmatpush3.bf16.msra.mxu0 %v626_v37 }
 0x133   :  { %676 = vmax.xlane.f32.xlu0 %v675_v54  ;;  %1251 = vmatprep.subr.bf16.mxu0 %v1407_v57 }
 0x137   :  { %599 = vmax.xlane.f32.xlu0 %v598_v55 }
 0x1b8   :  { %v674_v0 = vpop.xlane.xlu0 %673 }
 0x1b9   :  { %v678_v1 = vsub.f32 %v1796_v45, %v674_v0  ;;  %v1414_v0 = vld [vmem:[#allocation12 + $0x20] sm:$0xff]  }
 0x1bb   :  { %v680_v2 = vmul.f32 1.442695, %v678_v1  ;;  %v1415_v1 = vld [vmem:[#allocation12 + $0x58] sm:$0xff]  }
 0x1bc   :  { %v677_v3 = vpop.xlane.xlu0 %676 }
 0x1bd   :  { %1435 = vpow2.f32 %v680_v2  ;;  %v679_v4 = vsub.f32 %v1799_v52, %v677_v3  ;;  %v1416_v2 = vld [vmem:[#allocation12 + $0x18] sm:$0xff]   ;;  %v1417_v3 = vld [vmem:[#allocation12 + $0x50] sm:$0xff]  }
 0x1bf   :  { %v682_v5 = vmul.f32 1.442695, %v679_v4  ;;  %v1418_v4 = vld [vmem:[#allocation12 + $0x10] sm:$0xff]  }
 0x1c0   :  { %v600_v22 = vpop.xlane.xlu0 %599 }
 0x1c1   :  { %1437 = vpow2.f32 %v682_v5  ;;  %v604_v23 = vsub.f32 %v1796_v45, %v600_v22  ;;  %v1419_v5 = vld [vmem:[#allocation12 + $0x48] sm:$0xff]  }
 0x1c3   :  { %v606_v24 = vmul.f32 1.442695, %v604_v23 }
 0x1c5   :  { %1439 = vpow2.f32 %v606_v24 }
 0x1ca   :  { %v1436_v6 = vpop.eup %1435 }
 0x1cb   :  { %686 = vrot.lane.b32.xlu1 %v1436_v6, %s1613_s4 }
 0x1ce   :  { %v1438_v7 = vpop.eup %1437 }
 0x1cf   :  { %688 = vrot.lane.b32.xlu1 %v1438_v7, %s1613_s4 }
 0x1d2   :  { %v1440_v29 = vpop.eup %1439 }
 0x1d3   :  { %v610_v30 = vsel %vm597_vm3, %v1440_v29, 0.0 }
 0x1f1   :  { %v1232_v8 = vpop.f32.mrf.mxu0 }
 0x1f3   :  { %602 = vmax.xlane.f32.xlu1 %v601_v10  ;;  %v1233_v11 = vpop.f32.mrf.mxu0  ;;  %v1423_v10 = vld [vmem:[%s1919_s12 + $0x38] sm:$0xff]  }
 0x1f4   :  { %v1234_v12 = vadd.f32 %v1233_v11, %v1232_v8  ;;  %v1422_v8 = vld [vmem:[#allocation12] sm:$0xff]  }
 0x1f5   :  { %v1235_v14 = vpop.f32.mrf.mxu0  ;;  %v1424_v11 = vld [vmem:[%s1919_s12 + $0x30] sm:$0xff]  }
 0x1f6   :  { %v473_v16 = vadd.f32 %v1234_v12, %v1153_v13  ;;  %v1425_v12 = vld [vmem:[%s1919_s12 + $0x28] sm:$0xff]  }
 0x1f7   :  { %v1236_v15 = vpop.f32.mrf.mxu0 }
 0x1f8   :  { %v1237_v17 = vadd.f32 %v1236_v15, %v1235_v14  ;;  %v479_v19 = vmax.f32 %v473_v16, 0.0  ;;  %v1170_v14 = vld [vmem:[#allocation10] ss:$0 sm:$0xff] }
 0x1fa   :  { %v476_v18 = vadd.f32 %v1237_v17, %v1153_v13  ;;  %v1426_v13 = vld [vmem:[%s1919_s12 + $0x20] sm:$0xff]  }
 0x1fc   :  { %v480_v20 = vmax.f32 %v476_v18, 0.0 }
 0x1fe   :  { %v481_v21 = vpack.c.bf16 %v480_v20, %v479_v19 }
 0x200   :  { %1312 = vmatmul.mubr.bf16.vlgmr.msra.gmra.mxu1 %v481_v21 }
 0x201   :  { %1323 = vmatprep.mubr.msk.bf16.mxu1 %vm1612_vm1, %v1611_v9  ;;  %1322 = vmatpush3.bf16.msra.mxu1 %v626_v37  ;;  %v1431_v37 = vld [vmem:[%s1921_s14 + $0x18] sm:$0xff]  }
 0x202   :  { %1327 = vmatprep.subr.bf16.mxu1 %v1611_v9 }
 0x23d   :  { %v687_v25 = vpop.permute.xlu1 %686 }
 0x23e   :  { %v692_v26 = vsel %vm597_vm3, %v687_v25, 0.0 }
 0x23f   :  { %693 = vadd.xlane.f32.xlu0 %v692_v26 }
 0x241   :  { %v689_v27 = vpop.permute.xlu1 %688 }
 0x242   :  { %v695_v28 = vsel %vm597_vm3, %v689_v27, 0.0 }
 0x243   :  { %696 = vadd.xlane.f32.xlu0 %v695_v28 }
 0x247   :  { %611 = vadd.xlane.f32.xlu0 %v610_v30 }
 0x27c   :  { %v603_v31 = vpop.xlane.xlu1 %602 }
 0x27d   :  { %v605_v32 = vsub.f32 %v1799_v52, %v603_v31 }
 0x27f   :  { %v608_v33 = vmul.f32 1.442695, %v605_v32 }
 0x281   :  { %1441 = vpow2.f32 %v608_v33  ;;  %v1427_v33 = vld [vmem:[%s1919_s12 + $0x18] sm:$0xff]  }
 0x28e   :  { %v1442_v34 = vpop.eup %1441 }
 0x28f   :  { %v613_v35 = vsel %vm597_vm3, %v1442_v34, 0.0 }
 0x290   :  { %614 = vadd.xlane.f32.xlu0 %v613_v35  ;;  %v1429_v35 = vld [vmem:[%s1919_s12 + $0x8] sm:$0xff]  }
 0x2c0   :  { %v1832_v38 = vpop.f32.mrf.mxu1 }
 0x2c1   :  { %v588_v15 = vadd.f32 %v1170_v14, %v1832_v38 }
 0x2c2   :  { %v1313_v39 = vpop.f32.mrf.mxu1 }
 0x2c3   :  { %v594_v19 = vmax.f32 %v588_v15, 0.0 }
 0x2c4   :  { %v1834_v40 = vpop.f32.mrf.mxu1 }
 0x2c5   :  { %v591_v16 = vadd.f32 %v1170_v14, %v1834_v40 }
 0x2c6   :  { %v1314_v41 = vpop.f32.mrf.mxu1 }
 0x2c7   :  { %v595_v20 = vmax.f32 %v591_v16, 0.0  ;;  %v1181_v41 = vld [vmem:[%s1918_s11] ss:$0 sm:$0xff] }
 0x2c8   :  { %v694_v42 = vpop.xlane.xlu0 %693 }
 0x2c9   :  { %1443 = vrcp.f32 %v694_v42 }
 0x2cc   :  { %v697_v43 = vpop.xlane.xlu0 %696 }
 0x2cd   :  { %1445 = vrcp.f32 %v697_v43 }
 0x2d0   :  { %v612_v49 = vpop.xlane.xlu0 %611 }
 0x2d1   :  { %1447 = vrcp.f32 %v612_v49 }
 0x2d6   :  { %v1444_v44 = vpop.eup %1443 }
 0x2d7   :  { %v700_v46 = vmul.f32 %v1444_v44, %v1436_v6  ;;  %v1420_v6 = vld [vmem:[#allocation12 + $0x8] sm:$0xff]  }
 0x2da   :  { %v1446_v45 = vpop.eup %1445 }
 0x2db   :  { %v701_v47 = vmul.f32 %v1446_v45, %v1438_v7  ;;  %v1421_v7 = vld [vmem:[#allocation12 + $0x40] sm:$0xff]  }
 0x2dd   :  { %v702_v48 = vpack.c.bf16 %v701_v47, %v700_v46 }
 0x2de   :  { %v1448_v51 = vpop.eup %1447 }
 0x2df   :  { %704 = vrot.lane.b32.xlu0 %v702_v48, %s1613_s4  ;;  %v618_v53 = vmul.f32 %v1448_v51, %v1440_v29  ;;  %v1433_v51 = vld [vmem:[%s1921_s14 + $0x8] sm:$0xff]  }
 0x319   :  { %v615_v50 = vpop.xlane.xlu0 %614 }
 0x31a   :  { %1449 = vrcp.f32 %v615_v50  ;;  %v1432_v50 = vld [vmem:[%s1921_s14 + $0x10] sm:$0xff]  }
 0x327   :  { %v1450_v52 = vpop.eup %1449 }
 0x328   :  { %v619_v54 = vmul.f32 %v1450_v52, %v1442_v34  ;;  %v1428_v34 = vld [vmem:[%s1919_s12 + $0x10] sm:$0xff]   ;;  %v1434_v52 = vld [vmem:[%s1921_s14] sm:$0xff]  }
 0x32a   :  { %v620_v55 = vpack.c.bf16 %v619_v54, %v618_v53  ;;  %v1198_v53 = vld [vmem:[%s1920_s13] ss:$0 sm:$0xff] }
 0x32c   :  { %1318 = vmatmul.mubr.msk.bf16.vlgmr.msra.gmra.mxu0 %vm597_vm3, %v620_v55 }
 0x32d   :  { %1252 = vmatpush3.bf16.msra.mxu0 %v1408_v58 }
 0x32e   :  { %1253 = vmatprep.subr.bf16.mxu0 %v1409_v59 }
 0x331   :  { %1254 = vmatpush3.bf16.msra.mxu0 %v1410_v60 }
 0x332   :  { %1255 = vmatprep.subr.bf16.mxu0 %v1411_v61 }
 0x335   :  { %1256 = vmatpush3.bf16.msra.mxu0 %v1412_v62 }
 0x336   :  { %1257 = vmatprep.subr.bf16.mxu0 %v1413_v63 }
 0x339   :  { %1258 = vmatpush3.bf16.msra.mxu0 %v1414_v0 }
 0x33a   :  { %1259 = vmatprep.subr.bf16.mxu0 %v1415_v1 }
 0x33d   :  { %1260 = vmatpush3.bf16.msra.mxu0 %v1416_v2 }
 0x33e   :  { %1261 = vmatprep.subr.bf16.mxu0 %v1417_v3 }
 0x341   :  { %1262 = vmatpush3.bf16.msra.mxu0 %v1418_v4 }
 0x342   :  { %1263 = vmatprep.subr.bf16.mxu0 %v1419_v5 }
 0x345   :  { %1264 = vmatpush3.bf16.msra.mxu0 %v1420_v6 }
 0x346   :  { %1265 = vmatprep.subr.bf16.mxu0 %v1421_v7 }
 0x349   :  { %1266 = vmatpush3.bf16.msra.mxu0 %v1422_v8 }
 0x34a   :  { %1347 = vmatprep.subr.bf16.mxu0 %v1611_v9 }
 0x351   :  { %v705_v56 = vpop.permute.xlu0 %704 }
 0x352   :  { %1324 = vmatmul.mubr.msk.bf16.vlgmr.msra.gmra.mxu1 %vm597_vm3, %v705_v56 }
 0x353   :  { %1343 = vmatprep.mubr.msk.bf16.mxu1 %vm1612_vm1, %v1611_v9  ;;  %1328 = vmatpush3.bf16.msra.mxu1 %v1423_v10 }
 0x354   :  { %1329 = vmatprep.subr.bf16.mxu1 %v1611_v9 }
 0x357   :  { %1330 = vmatpush3.bf16.msra.mxu1 %v1424_v11 }
 0x358   :  { %1331 = vmatprep.subr.bf16.mxu1 %v1611_v9 }
 0x35b   :  { %1332 = vmatpush3.bf16.msra.mxu1 %v1425_v12 }
 0x35c   :  { %1333 = vmatprep.subr.bf16.mxu1 %v1611_v9 }
 0x35f   :  { %1334 = vmatpush3.bf16.msra.mxu1 %v1426_v13 }
 0x360   :  { %1335 = vmatprep.subr.bf16.mxu1 %v1611_v9 }
 0x363   :  { %1336 = vmatpush3.bf16.msra.mxu1 %v1427_v33 }
 0x364   :  { %1337 = vmatprep.subr.bf16.mxu1 %v1611_v9 }
 0x367   :  { %1338 = vmatpush3.bf16.msra.mxu1 %v1428_v34 }
 0x368   :  { %1339 = vmatprep.subr.bf16.mxu1 %v1611_v9 }
 0x36b   :  { %1340 = vmatpush3.bf16.msra.mxu1 %v1429_v35 }
 0x36c   :  { %1341 = vmatprep.subr.bf16.mxu1 %v1611_v9 }
 0x36f   :  { %1342 = vmatpush3.bf16.msra.mxu1 %v1430_v36 }
 0x3ec   :  { %v662_v17 = vpop.f32.mrf.mxu0 }
 0x3ed   :  { %v669_v22 = vmul.f32 %v662_v17, %v594_v19 }
 0x3ee   :  { %v1319_v18 = vpop.f32.mrf.mxu0 }
 0x3f0   :  { %v665_v21 = vpop.f32.mrf.mxu0 }
 0x3f1   :  { %v670_v23 = vmul.f32 %v665_v21, %v595_v20 }
 0x3f2   :  { %v1320_v24 = vpop.f32.mrf.mxu0 }
 0x3f3   :  { %v752_v25 = vpack.c.bf16 %v670_v23, %v669_v22 }
 0x412   :  { %v743_v26 = vpop.f32.mrf.mxu1 }
 0x413   :  { %v750_v29 = vmul.f32 %v743_v26, %v594_v19 }
 0x414   :  { %v1325_v27 = vpop.f32.mrf.mxu1 }
 0x416   :  { %v746_v28 = vpop.f32.mrf.mxu1 }
 0x417   :  { %v751_v30 = vmul.f32 %v746_v28, %v595_v20 }
 0x418   :  { %v1326_v31 = vpop.f32.mrf.mxu1 }
 0x419   :  { %v753_v32 = vpack.c.bf16 %v751_v30, %v750_v29 }
 0x41b   :  { %921 = vmatprep.mubr.bf16.mxu0 %v753_v32 }
 0x41c   :  { %922 = vmatmul.mubr.bf16.vlgmr.msra.gmra.mxu0 %v752_v25 }
 0x41d   :  { %1355 = vmatprep.mubr.msk.bf16.mxu0 %vm1612_vm1, %v1611_v9  ;;  %1348 = vmatpush3.bf16.msra.mxu0 %v1431_v37 }
 0x41e   :  { %1349 = vmatprep.subr.bf16.mxu0 %v1611_v9 }
 0x421   :  { %1350 = vmatpush3.bf16.msra.mxu0 %v1432_v50 }
 0x422   :  { %1351 = vmatprep.subr.bf16.mxu0 %v1611_v9 }
 0x425   :  { %1352 = vmatpush3.bf16.msra.mxu0 %v1433_v51 }
 0x426   :  { %1353 = vmatprep.subr.bf16.mxu0 %v1611_v9  ;;  %v1207_v9 = vld [vmem:[%s1922_s15] ss:$0 sm:$0xff] }
 0x429   :  { %1354 = vmatpush3.bf16.msra.mxu0 %v1434_v52 }
 0x4dc   :  { %v1267_v38 = vpop.f32.mrf.mxu0 }
 0x4de   :  { %v1268_v39 = vpop.f32.mrf.mxu0 }
 0x4df   :  { %v1269_v40 = vadd.f32 %v1268_v39, %v1267_v38 }
 0x4e0   :  { %v1270_v42 = vpop.f32.mrf.mxu0 }
 0x4e1   :  { %v924_v44 = vadd.f32 %v1269_v40, %v1181_v41 }
 0x4e2   :  { %v1271_v43 = vpop.f32.mrf.mxu0 }
 0x4e3   :  { %v1272_v45 = vadd.f32 %v1271_v43, %v1270_v42  ;;  %v930_v47 = vmax.f32 %v924_v44, 0.0 }
 0x4e5   :  { %v927_v46 = vadd.f32 %v1272_v45, %v1181_v41 }
 0x4e7   :  { %v931_v48 = vmax.f32 %v927_v46, 0.0 }
 0x4e9   :  { %v932_v49 = vpack.c.bf16 %v931_v48, %v930_v47 }
 0x4eb   :  { %1344 = vmatmul.mubr.bf16.vlgmr.msra.gmra.mxu1 %v932_v49 }
 0x5ab   :  { %v1038_v54 = vpop.f32.mrf.mxu1 }
 0x5ac   :  { %v1039_v56 = vadd.f32 %v1198_v53, %v1038_v54 }
 0x5ad   :  { %v1345_v55 = vpop.f32.mrf.mxu1 }
 0x5ae   :  { %v1045_v60 = vmax.f32 %v1039_v56, 0.0 }
 0x5af   :  { %v1041_v57 = vpop.f32.mrf.mxu1 }
 0x5b0   :  { %v1042_v58 = vadd.f32 %v1198_v53, %v1041_v57 }
 0x5b1   :  { %v1346_v59 = vpop.f32.mrf.mxu1 }
 0x5b2   :  { %v1046_v61 = vmax.f32 %v1042_v58, 0.0 }
 0x5b4   :  { %v1047_v62 = vpack.c.bf16 %v1046_v61, %v1045_v60 }
 0x5b6   :  { %1356 = vmatmul.mubr.msk.bf16.vlgmr.msra.gmra.mxu0 %vm1087_vm5, %v1047_v62 }
 0x676   :  { %v1125_v63 = vpop.f32.mrf.mxu0 }
 0x677   :  { %v1126_v0 = vadd.f32 %v1207_v9, %v1125_v63 }
 0x678   :  { %v1357_v1 = vpop.f32.mrf.mxu0 }
 0x679   :  { %1133 = vst.msk [vmem:[%s1923_s16] sm:$0xff] %vm1132_vm6, %v1126_v0 }
 0x67a   :  { %v1128_v2 = vpop.f32.mrf.mxu0 }
 0x67b   :  { %v1129_v3 = vadd.f32 %v1207_v9, %v1128_v2 }
 0x67c   :  { %v1358_v4 = vpop.f32.mrf.mxu0 }
 0x67d   :  { %1134 = vst.msk [vmem:[%s1923_s16 + $0x8] sm:$0xff] %vm1132_vm6, %v1129_v3 }
 0x67e   :  { %1139 = vsyncpa [#allocation3], 1 }
 0x67f   :  { %1140 = vsyncpa [#allocation5], 1 }
 0x680   :  { %1141 = vsyncpa [#allocation8], 1 }
 0x681   :  { %1142 = vsyncpa [#allocation11], 1 }

</bundles_post_ra>
